<compile_context>
chip_gen: v7x
topology: tpu7x:2x2x1
jax: 0.10.0
libtpu: 0.0.40
codegen_flags: <defaults>
</compile_context>

<pallas_src>
import jax
import jax.numpy as jnp
from jax import lax
from jax.experimental import pallas as pl
from jax.experimental.pallas import tpu as pltpu

# ----------------------------- static config --------------------------------
B = 8                 # demo batch
NUM_CAT = 10          # features['category_id']['num_id']
DIM_CAT = 8           # features['category_id']['dim_out']
NUM_HOUR = 24
DIM_HOUR = 4          # features['hour_and_weekday']['dim_hour']
NUM_WDAY = 7
DIM_WDAY = 4          # features['hour_and_weekday']['dim_weekday'] (4+4 == dim_out)
DIM_W2V = 16          # features['word2vec']['dim_out']
DIM_QLEN = 1          # features['q_length']['dim_out']
DIM_WCNT = 1          # features['word_count']['dim_out']
DIM_HIDDEN = DIM_QLEN + DIM_CAT + (DIM_HOUR + DIM_WDAY) + DIM_W2V + DIM_WCNT  # 34
DIM_OUT = 32          # last_features (int) -> nn.Linear(DIM_HIDDEN, DIM_OUT)

# Fused-feature layout: columns of the (B, DIM_FEAT) block == rows of W_fused.
#   [ q_len | cat 1-hot(10) | hour 1-hot(24) | wday 1-hot(7) | w2v(16) | wcnt
#     | 1 (bias) | cat_id | hour_id | wday_id | pad ]
OFF_QLEN = 0
OFF_CAT = 1
OFF_HOUR = OFF_CAT + NUM_CAT            # 11
OFF_WDAY = OFF_HOUR + NUM_HOUR          # 35
OFF_W2V = OFF_WDAY + NUM_WDAY           # 42
OFF_WCNT = OFF_W2V + DIM_W2V            # 58
OFF_ONE = OFF_WCNT + DIM_WCNT           # 59 (constant 1.0 column -> bias row)
OFF_CAT_ID = OFF_ONE + 1                # 60 (float-encoded ids: weight rows are 0)
OFF_HOUR_ID = OFF_CAT_ID + 1            # 61
OFF_WDAY_ID = OFF_HOUR_ID + 1           # 62
DIM_FEAT = 64                           # 63 = pad column (weight row 0)


# ------------------------------- kernel --------------------------------------
def question_encoder_kernel(x_ref, w_ref, out_ref):
    # x_ref  : (TB, 64) f32 -- [q_len | zeros(41) | w2v | wcnt | 1 | cat | hour | wday | 0]
    # w_ref  : (64, 32) f32 -- pre-fused (embeddings + Linear + bias, id/pad rows = 0)
    # out_ref: (TB, 32) f32
    x = x_ref[...]
    cat = x[:, OFF_CAT_ID:OFF_CAT_ID + 1].astype(jnp.int32)    # (TB, 1)
    hour = x[:, OFF_HOUR_ID:OFF_HOUR_ID + 1].astype(jnp.int32)
    wday = x[:, OFF_WDAY_ID:OFF_WDAY_ID + 1].astype(jnp.int32)

    # Combined one-hot for the three embedding lookups: pure VPU work
    # (one iota, three compares, two ORs).  Target ranges [1,11), [11,35),
    # [35,42) are disjoint and never touch the id/pad columns (>=60), so the OR
    # is exactly the concatenation of the three one-hots; the one-hot span of
    # `x` is zero, so a single add places everything.
    lanes = lax.broadcasted_iota(jnp.int32, x.shape, 1)
    onehot = ((lanes == cat + OFF_CAT)
              | (lanes == hour + OFF_HOUR)
              | (lanes == wday + OFF_WDAY)).astype(jnp.float32)
    feat = x + onehot                                           # (TB, 64)

    # One MXU matmul: embeddings, Linear weight and bias all folded into w_ref.
    out_ref[...] = jnp.dot(feat, w_ref[...], preferred_element_type=jnp.float32)


# ----------------------------- param fusion -----------------------------------
def _fuse_params(params):
    """Fold embedding tables + Linear weight + bias into one (64, 32) matrix."""
    W = params["W"]                          # (34, 32)  (already x @ W layout)
    b = params["b"].reshape(1, DIM_OUT)      # (1, 32)
    hp = jax.lax.Precision.HIGHEST
    w_qlen = W[0:1]                                                     # (1, 32)
    w_cat = jnp.dot(params["cat_emb"], W[1:9], precision=hp)            # (10, 32)
    w_hour = jnp.dot(params["hour_emb"], W[9:13], precision=hp)         # (24, 32)
    w_wday = jnp.dot(params["wday_emb"], W[13:17], precision=hp)        # (7, 32)
    w_w2v = W[17:33]                                                    # (16, 32)
    w_wcnt = W[33:34]                                                   # (1, 32)
    w_zero = jnp.zeros((DIM_FEAT - OFF_CAT_ID, DIM_OUT), jnp.float32)   # (4, 32)
    return jnp.concatenate(
        [w_qlen, w_cat, w_hour, w_wday, w_w2v, w_wcnt, b, w_zero], axis=0)  # (64, 32)


# ------------------------------- wrapper --------------------------------------
def question_encoder(question_input, params):
    """question_input: dict of feature arrays (torch-shaped); params: dict of weights."""
    # Glue: the squeeze(dim=1) from the torch forward + dtype normalization.
    q_len = jnp.squeeze(question_input["q_length"], axis=1).astype(jnp.float32)   # (B,1)
    w2v = jnp.squeeze(question_input["word2vec"], axis=1).astype(jnp.float32)     # (B,16)
    wcnt = jnp.squeeze(question_input["word_count"], axis=1).astype(jnp.float32)  # (B,1)
    cat_id = question_input["category_id"].astype(jnp.float32)                    # (B,1)
    hw_id = question_input["hour_and_weekday"].astype(jnp.float32)                # (B,2)

    bn = q_len.shape[0]
    n_onehot = NUM_CAT + NUM_HOUR + NUM_WDAY   # 41 zero columns (filled in-kernel)

    # Single packed f32 slab:
    #   [q_len | zeros(41) | w2v | wcnt | 1 | cat_id | hour_id | wday_id | 0] -> (B, 64)
    acts = jnp.concatenate(
        [q_len,
         jnp.zeros((bn, n_onehot), jnp.float32),
         w2v,
         wcnt,
         jnp.ones((bn, 1), jnp.float32),
         cat_id,
         hw_id,
         jnp.zeros((bn, 1), jnp.float32)],
        axis=-1)
    assert acts.shape[-1] == DIM_FEAT

    w_fused = _fuse_params(params)             # (64, 32)

    # Row tiling: fill the MXU M-dim / amortize launch overhead when batched;
    # tiny batches are padded up to a sublane multiple.
    if bn >= 512:
        tb = 512
    elif bn >= 256:
        tb = 256
    elif bn >= 128:
        tb = 128
    else:
        tb = ((bn + 7) // 8) * 8
    n_blocks = pl.cdiv(bn, tb)
    b_pad = n_blocks * tb
    if b_pad != bn:
        acts = jnp.pad(acts, ((0, b_pad - bn), (0, 0)))   # id 0 is in-range -> safe

    # NOTE: out-of-range ids silently give an all-zero one-hot row (zero embedding)
    # instead of erroring like torch.nn.Embedding.
    out = pl.pallas_call(
        question_encoder_kernel,
        out_shape=jax.ShapeDtypeStruct((b_pad, DIM_OUT), jnp.float32),
        grid_spec=pltpu.PrefetchScalarGridSpec(
            num_scalar_prefetch=0,
            grid=(n_blocks,),
            in_specs=[
                pl.BlockSpec((tb, DIM_FEAT), lambda i: (i, 0)),
                # constant block index -> weight stays VMEM-resident across steps
                pl.BlockSpec((DIM_FEAT, DIM_OUT), lambda i: (0, 0)),
            ],
            out_specs=pl.BlockSpec((tb, DIM_OUT), lambda i: (i, 0)),
        ),
        compiler_params=pltpu.CompilerParams(
            dimension_semantics=("parallel",)),   # batch axis split across TCs on v7x
    )(acts, w_fused)
    return out[:bn]


# --------------------------- pure-JAX reference --------------------------------
def question_encoder_ref(question_input, params):
    q_len = jnp.squeeze(question_input["q_length"], axis=1).astype(jnp.float32)
    w2v = jnp.squeeze(question_input["word2vec"], axis=1).astype(jnp.float32)
    wcnt = jnp.squeeze(question_input["word_count"], axis=1).astype(jnp.float32)
    cat_h = jnp.take(params["cat_emb"], question_input["category_id"][:, 0], axis=0)
    hour_h = jnp.take(params["hour_emb"], question_input["hour_and_weekday"][:, 0], axis=0)
    wday_h = jnp.take(params["wday_emb"], question_input["hour_and_weekday"][:, 1], axis=0)
    hidden = jnp.concatenate([q_len, cat_h, hour_h, wday_h, w2v, wcnt], axis=-1)
    return hidden @ params["W"] + params["b"]


# ---------------------------------- main ----------------------------------------
if __name__ == "__main__":
    key = jax.random.PRNGKey(0)
    (k_cat, k_hour, k_wday, k_w, k_b,
     k_qlen, k_cid, k_hw, k_w2v, k_wcnt) = jax.random.split(key, 10)

    # Deterministic synthetic parameters (shapes from __init__).
    params = {
        "cat_emb": jax.random.normal(k_cat, (NUM_CAT, DIM_CAT), jnp.float32) * 0.1,
        "hour_emb": jax.random.normal(k_hour, (NUM_HOUR, DIM_HOUR), jnp.float32) * 0.1,
        "wday_emb": jax.random.normal(k_wday, (NUM_WDAY, DIM_WDAY), jnp.float32) * 0.1,
        # torch nn.Linear stores (out, in); we keep the (in, out) transpose for x @ W.
        "W": jax.random.normal(k_w, (DIM_HIDDEN, DIM_OUT), jnp.float32) * 0.1,
        "b": jax.random.normal(k_b, (1, DIM_OUT), jnp.float32) * 0.1,
    }

    # Deterministic synthetic inputs (torch-style shapes, squeezed in the wrapper).
    question_input = {
        "q_length": jax.random.normal(k_qlen, (B, 1, DIM_QLEN), jnp.float32),
        "category_id": jax.random.randint(k_cid, (B, 1), 0, NUM_CAT, jnp.int32),
        "hour_and_weekday": jnp.stack(
            [jax.random.randint(k_hw, (B,), 0, NUM_HOUR, jnp.int32),
             jax.random.randint(jax.random.fold_in(k_hw, 1), (B,), 0, NUM_WDAY, jnp.int32)],
            axis=-1,
        ),
        "word2vec": jax.random.normal(k_w2v, (B, 1, DIM_W2V), jnp.float32),
        "word_count": jax.random.normal(k_wcnt, (B, 1, DIM_WCNT), jnp.float32),
    }

    out = question_encoder(question_input, params)
    out = jax.block_until_ready(out)

    ref = question_encoder_ref(question_input, params)
    assert out.shape == (B, DIM_OUT), out.shape
    # Tolerance covers MXU dot-precision differences between the fused single-matmul
    # path and the unfused reference; structural bugs would be O(0.1) or larger.
    assert jnp.allclose(out, ref, atol=2e-3, rtol=2e-3), "mismatch vs pure-JAX reference"

    print("KERNEL_OK")
</pallas_src>

<mosaic_0001>
module attributes {stable_mosaic.version = 11 : i64} {
  func.func @question_encoder_kernel(%arg0: i32, %arg1: memref<8x64xf32, #tpu.memory_space<vmem>>, %arg2: memref<64x32xf32, #tpu.memory_space<vmem>>, %arg3: memref<8x32xf32, #tpu.memory_space<vmem>>) attributes {dimension_semantics = [#tpu.dimension_semantics<parallel>], iteration_bounds = array<i64: 1>, scalar_prefetch = 0 : i64, scratch_operands = 0 : i64, tpu.core_type = #tpu.core_type<tc>, window_params = [{transform_indices = @transform_0, window_bounds = array<i64: 8, 64>}, {pipeline_mode = #tpu.pipeline_mode<synchronous>, transform_indices = @transform_1, window_bounds = array<i64: 64, 32>}, {transform_indices = @transform_2, window_bounds = array<i64: 8, 32>}]} {
    %c0 = arith.constant 0 : index
    %c0_0 = arith.constant 0 : index
    %0 = vector.load %arg1[%c0, %c0_0] : memref<8x64xf32, #tpu.memory_space<vmem>>, vector<8x64xf32>
    %1 = vector.extract_strided_slice %0 {offsets = [0, 60], sizes = [8, 1], strides = [1, 1]} : vector<8x64xf32> to vector<8x1xf32>
    %2 = arith.fptosi %1 : vector<8x1xf32> to vector<8x1xi32>
    %3 = vector.extract_strided_slice %0 {offsets = [0, 61], sizes = [8, 1], strides = [1, 1]} : vector<8x64xf32> to vector<8x1xf32>
    %4 = arith.fptosi %3 : vector<8x1xf32> to vector<8x1xi32>
    %5 = vector.extract_strided_slice %0 {offsets = [0, 62], sizes = [8, 1], strides = [1, 1]} : vector<8x64xf32> to vector<8x1xf32>
    %6 = arith.fptosi %5 : vector<8x1xf32> to vector<8x1xi32>
    %7 = tpu.iota {dimensions = array<i32: 1>} : vector<8x64xi32>
    %c1_i32 = arith.constant 1 : i32
    %8 = vector.broadcast %c1_i32 : i32 to vector<8x1xi32>
    %9 = arith.addi %2, %8 : vector<8x1xi32>
    %10 = vector.broadcast %9 : vector<8x1xi32> to vector<8x64xi32>
    %11 = arith.cmpi eq, %7, %10 : vector<8x64xi32>
    %c11_i32 = arith.constant 11 : i32
    %12 = vector.broadcast %c11_i32 : i32 to vector<8x1xi32>
    %13 = arith.addi %4, %12 : vector<8x1xi32>
    %14 = vector.broadcast %13 : vector<8x1xi32> to vector<8x64xi32>
    %15 = arith.cmpi eq, %7, %14 : vector<8x64xi32>
    %16 = arith.ori %11, %15 : vector<8x64xi1>
    %c35_i32 = arith.constant 35 : i32
    %17 = vector.broadcast %c35_i32 : i32 to vector<8x1xi32>
    %18 = arith.addi %6, %17 : vector<8x1xi32>
    %19 = vector.broadcast %18 : vector<8x1xi32> to vector<8x64xi32>
    %20 = arith.cmpi eq, %7, %19 : vector<8x64xi32>
    %21 = arith.ori %16, %20 : vector<8x64xi1>
    %22 = arith.extui %21 : vector<8x64xi1> to vector<8x64xi32>
    %23 = arith.sitofp %22 : vector<8x64xi32> to vector<8x64xf32>
    %24 = arith.addf %0, %23 : vector<8x64xf32>
    %c0_1 = arith.constant 0 : index
    %c0_2 = arith.constant 0 : index
    %25 = vector.load %arg2[%c0_1, %c0_2] : memref<64x32xf32, #tpu.memory_space<vmem>>, vector<64x32xf32>
    %cst = arith.constant dense<0.000000e+00> : vector<8x32xf32>
    %26 = tpu.matmul %24, %25, %cst {dimension_numbers = #tpu.dot_dimension_numbers<[1], [0], [0], [1], [0, 0, 1, 1], [], []>} : vector<8x64xf32>, vector<64x32xf32>, vector<8x32xf32> -> vector<8x32xf32>
    %c0_3 = arith.constant 0 : index
    %c0_4 = arith.constant 0 : index
    %27 = vector.load %arg3[%c0_3, %c0_4] : memref<8x32xf32, #tpu.memory_space<vmem>>, vector<8x32xf32>
    tpu.vector_store %arg3[%c0_3, %c0_4], %26 {strides = array<i32>} : memref<8x32xf32, #tpu.memory_space<vmem>>, vector<8x32xf32>,
    return
  }
  func.func @transform_0(%arg0: i32) -> (i32, i32) {
    %c0_i32 = arith.constant 0 : i32
    %c0_i32_0 = arith.constant 0 : i32
    return %arg0, %c0_i32 : i32, i32
  }
  func.func @transform_1(%arg0: i32) -> (i32, i32) {
    %c0_i32 = arith.constant 0 : i32
    %c0_i32_0 = arith.constant 0 : i32
    %c0_i32_1 = arith.constant 0 : i32
    return %c0_i32, %c0_i32_0 : i32, i32
  }
  func.func @transform_2(%arg0: i32) -> (i32, i32) {
    %c0_i32 = arith.constant 0 : i32
    %c0_i32_0 = arith.constant 0 : i32
    return %arg0, %c0_i32 : i32, i32
  }
}

</mosaic_0001>

<bundles_post_ra>
// kernel: tpu_custom_call.1
= control target key start
LH: loop header
LB: loop body
LE: loop exit
PB: predicated region body
PF: predicated region fallthrough
CT: control target
= control target key end

     0   :  { %v213_v2 = vmov 60   ;;  %v214_v4 = vmov 62   ;;  %s274_s0 = inlined_call_operand.vmem [shape: f32[8,64], index: 0, kind: input, shape index: {}]   ;;  %s275_s1 = inlined_call_operand.vmem [shape: f32[64,32], index: 1, kind: input, shape index: {}]   ;;  %s276_s2 = inlined_call_operand.hbm [shape: f32[8,32], index: 2, kind: output, shape index: {}]  }
   0x1   :  { %v12_v0 = vld [vmem:[%s274_s0] sm:$0xff]  ;;  %185 = vset.pattern.permute.xlu0 %v213_v2  ;;  %187 = vset.pattern.permute.xlu1 %v214_v4  ;;  %v37_v5 = vld [vmem:[%s275_s1 + $0x8] sm:$0xff] }
   0x2   :  { %v36_v1 = vld [vmem:[%s275_s1] sm:$0xff]  ;;  %v176_v3 = vtrunc.f32 %v12_v0 }
   0x3   :  { %7 = vsyncpa [#allocation3], 0  ;;  %v215_v6 = vmov 0.0|0.0   ;;  %v165_v7 = vpack.c.bf16 %v37_v5, %v36_v1  ;;  %v38_v9 = vld [vmem:[%s275_s1 + $0x10] sm:$0xff]  ;;  %v39_v10 = vld [vmem:[%s275_s1 + $0x18] sm:$0xff]  ;;  %v216_v18 = vmov 61   ;;  %v14_v23 = vlaneseq }
   0x4   :  { %164 = vmatprep.subr.bf16.mxu0 %v215_v6  ;;  %v177_v8 = vcvt.f32.s32 %v176_v3  ;;  %v168_v13 = vpack.c.bf16 %v39_v10, %v38_v9  ;;  %v40_v14 = vld [vmem:[%s275_s1 + $0x20] sm:$0xff]  ;;  %v41_v15 = vld [vmem:[%s275_s1 + $0x28] sm:$0xff]  ;;  %v42_v19 = vld [vmem:[%s275_s1 + $0x30] sm:$0xff]  ;;  %vm217_vm0 = vmmov 0   ;;  %v218_v22 = vmov 0.0  }
   0x5   :  { %166 = vmatpush3.bf16.msra.mxu0 %v165_v7  ;;  %v171_v17 = vpack.c.bf16 %v41_v15, %v40_v14  ;;  %v43_v20 = vld [vmem:[%s275_s1 + $0x38] sm:$0xff]  ;;  %161 = vmatprep.mubr.msk.f32.mxu0 %vm217_vm0, %v218_v22  ;;  %v15_v25 = vand.u32 127, %v14_v23  ;;  %vm44_vm6 = vcmask 523264   ;;  %s219_s1 = smov [#allocation2]   ;;  %vm118_vm7 = vcmask 261120  }
   0x6   :  { %v16_v11 = vadd.s32 1, %v177_v8  ;;  %v27_v12 = vadd.s32 35, %v177_v8  ;;  %167 = vmatprep.subr.bf16.mxu0 %v215_v6  ;;  %v21_v16 = vadd.s32 11, %v177_v8  ;;  %v174_v21 = vpack.c.bf16 %v43_v20, %v42_v19  ;;  %s126_s26 = sshll.u32 %s219_s1, 4  ;;  %s127_s26 = int_to_ptr.vmem [resolvable:$true] %s126_s26 }
   0x7   :  { %s189_s27 = scalar_lea.vmem %s127_s26, 128  ;;  %p194_p1 = scmp.lt.s32.totalorder %s127_s26, %s127_s26 }
   0x8   :  { %18 = vperm.xlu0 %185, %v16_v11   ;;  %29 = vperm.xlu1 %187, %v27_v12   ;;  %p190_p0 = scmp.ne.s32.totalorder %s127_s26, %s189_s27  ;;  %p195_p2 = scmp.lt.s32.totalorder %s189_s27, %s189_s27 }
   0x9   :  { %169 = vmatpush3.bf16.msra.mxu0 %v168_v13 }
   0xa   :  { %170 = vmatprep.subr.bf16.mxu0 %v215_v6  ;;  %p196_p3 = por %p195_p2, %p194_p1 }
   0xc   :  { %186 = vset.pattern.permute.xlu0 %v216_v18  ;;  %p197_p4 = pnand %p196_p3, %p190_p0 }
   0xd   :  { %23 = vperm.xlu0 %186, %v21_v16   ;;  %172 = vmatpush3.bf16.msra.mxu0 %v171_v17 }
   0xe   :  { %173 = vmatprep.subr.bf16.mxu0 %v215_v6 }
  0x11   :  { %175 = vmatpush3.bf16.msra.mxu0 %v174_v21  ;;  %188 = vset.pattern.permute.xlu0 %v214_v4 }
  0x87   :  { %v19_v24 = vpop.permute.xlu0 %18  ;;  %v30_v26 = vpop.permute.xlu1 %29 }
  0x88   :  { %vm31_vm1 = vcmp.eq.s32.totalorder %v15_v25, %v30_v26  ;;  %vm20_vm2 = vcmp.eq.s32.totalorder %v15_v25, %v19_v24 }
  0x8c   :  { %v24_v27 = vpop.permute.xlu0 %23 }
  0x8d   :  { %vm25_vm3 = vcmp.eq.s32.totalorder %v15_v25, %v24_v27 }
  0x8e   :  { %vm26_vm4 = vmor %vm20_vm2, %vm25_vm3 }
  0x8f   :  { %vm32_vm5 = vmor %vm26_vm4, %vm31_vm1 }
  0x90   :  { %v134_v28 = vsel %vm32_vm5, 1.0, %v218_v22 }
  0x91   :  { %v35_v29 = vadd.f32 %v134_v28, %v12_v0 }
  0x93   :  { %162 = vmatmul.mubr.msk.f32.vlgmr.msra.gmra.mrb[0].mxu0 %vm44_vm6, %v35_v29 }
 0x166   :  { %v114_v30 = vpop.f32.mrb[0].mxu0 }
 0x167   :  { %119 = vst.msk [vmem:[#allocation2] sm:$0xff] %vm118_vm7, %v114_v30  ;;  %v163_v31 = vpop.f32.mrb[1].mxu0 }
 0x168   :  { %200 = shalt.err (!%p197_p4)
}
 0x169   :  { %s201_s30 = scalar_lea.hbm %s276_s2, 128 }
 0x16a   :  { %p202_p5 = scmp.ne.s32.totalorder %s276_s2, %s201_s30  ;;  %p205_p6 = scmp.lt.u32.totalorder %s201_s30, %s276_s2 }
 0x16c   :  { %p207_p7 = pnand %p205_p6, %p202_p5 }
 0x16e   :  { %210 = shalt.err (!%p207_p7)
}
 0x16f   :  { %129 = dma.vmem_to_hbm [thread:$0]  %s127_s26, 128, %s276_s2, [#allocation3]  }
 0x170   :  { %211 = dma.done.wait [#allocation3], 128  }
 0x171   :  { %212 = vsyncadd [#allocation3], 4294967168 }
 0x172   :  { %133 = vsyncpa [#allocation3], 1 }

</bundles_post_ra>
